<compile_context>
chip_gen: v7x
topology: tpu7x:2x2x1
jax: 0.10.0
libtpu: 0.0.40
codegen_flags: <defaults>
</compile_context>

<pallas_src>
import math

import jax
import jax.numpy as jnp
from jax.experimental import pallas as pl
from jax.experimental.pallas import tpu as pltpu


def _make_gcn_kernel(B, Fin, Fout, pad, has_bias):
    """Kernel body for one row-tile of the output slab."""

    def kernel(att_ref, x_ref, w_ref, *rest):
        # att_ref: (tile_N, N)     row tile of the attention/adjacency matrix
        # x_ref:   (N, B*Fin)      batch-fused input slab (resident)
        # w_ref:   (Fin, Fout)     weight (resident)
        # b_ref:   (1, Fout)       bias (resident, only if has_bias)
        # o_ref:   (tile_N, Lpad)  lane-dense output slab tile
        if has_bias:
            b_ref, o_ref = rest
            bias = b_ref[...]                              # (1, Fout), f32
        else:
            (o_ref,) = rest
            bias = None

        # First matmul: one MXU call covering every batch element.
        tmp = jnp.dot(att_ref[...], x_ref[...],
                      preferred_element_type=jnp.float32)   # (tile_N, B*Fin) f32

        w = w_ref[...]
        cols = []
        # Static unroll over the (small) batch: contraction stays Fin, so the MAC
        # count is B*tile_N*Fin*Fout (no block-diagonal / zero-column waste).
        for b in range(B):
            tmp_b = tmp[:, b * Fin:(b + 1) * Fin]            # (tile_N, Fin)
            out_b = jnp.dot(tmp_b, w, preferred_element_type=jnp.float32)
            if has_bias:
                out_b = out_b + bias
            cols.append(out_b)
        if pad:
            # Zero-fill the padded lanes so the final store is a single full-width
            # unmasked vst (the padded columns are sliced off in the wrapper).
            cols.append(jnp.zeros((tmp.shape[0], pad), jnp.float32))

        out = cols[0] if len(cols) == 1 else jnp.concatenate(cols, axis=1)
        o_ref[...] = out.astype(o_ref.dtype)

    return kernel


def graph_convolution_o(x, weight, att, bias=None, *, compute_dtype=None):
    """x: [B, N, Fin]; weight: [Fin, Fout]; att: [N, N]; bias: [Fout] or None.

    Returns [B, N, Fout] == att @ (x @ weight) (+ bias), computed as
    (att @ x) @ weight inside a row-tiled Pallas kernel.
    compute_dtype: optional dtype (e.g. jnp.bfloat16) for att/x/weight DMA traffic;
    accumulation, bias add and the output stay float32-accurate.
    """
    B, N, Fin = x.shape
    Fout = weight.shape[1]
    lanes = B * Fout
    Lpad = ((lanes + 127) // 128) * 128
    pad = Lpad - lanes
    out_dtype = x.dtype

    cdt = jnp.dtype(compute_dtype) if compute_dtype is not None else jnp.dtype(x.dtype)
    in_itemsize = cdt.itemsize
    out_itemsize = jnp.dtype(out_dtype).itemsize
    has_bias = bias is not None

    # ---- wrapper-side layout plumbing (XLA, outside the kernel) ----
    # x: (B, N, Fin) -> (N, B*Fin) slab; column block b holds x[b].
    x_slab = jnp.transpose(x, (1, 0, 2)).reshape(N, B * Fin).astype(cdt)
    att_c = att.astype(cdt)
    w_c = weight.astype(cdt)

    # ---- row-tile selection ----
    if N <= 512:
        tile_n = N                      # single grid step: everything fits easily
    else:
        budget = 36 * 1024 * 1024       # working budget, safe for v7x's 64 MiB VMEM
        resident = 2 * (N * B * Fin + Fin * Fout) * in_itemsize + 2 * Fout * 4
        # per output row: double-buffered att tile row + double-buffered out row
        # + f32 intermediate row (kept in vregs/VMEM between the two matmuls).
        per_row = 2 * N * in_itemsize + 2 * Lpad * out_itemsize + B * Fin * 4
        tile_n = ((budget - resident) // per_row) // 256 * 256
        tile_n = max(256, min(512, tile_n))   # MXU-friendly multiple of 256, v7x-safe cap
    grid = (pl.cdiv(N, tile_n),)

    # ---- specs ----
    in_specs = [
        pl.BlockSpec((tile_n, N), lambda i: (i, 0)),       # att row tile (pipelined)
        pl.BlockSpec((N, B * Fin), lambda i: (0, 0)),      # x slab, resident
        pl.BlockSpec((Fin, Fout), lambda i: (0, 0)),       # weight, resident
    ]
    args = [att_c, x_slab, w_c]
    if has_bias:
        in_specs.append(pl.BlockSpec((1, Fout), lambda i: (0, 0)))  # bias, resident
        args.append(bias.reshape(1, Fout).astype(jnp.float32))
    out_specs = pl.BlockSpec((tile_n, Lpad), lambda i: (i, 0))

    # ---- explicit VMEM budget + cost estimate ----
    need = (2 * tile_n * N * in_itemsize            # att tile, double-buffered
            + 2 * N * B * Fin * in_itemsize         # x slab
            + 2 * Fin * Fout * in_itemsize          # weight
            + (2 * Fout * 4 if has_bias else 0)     # bias
            + 2 * tile_n * Lpad * out_itemsize      # out tile, double-buffered
            + tile_n * B * Fin * 4)                 # f32 intermediate
    vmem_limit = int(min(max(need + (8 << 20), 32 << 20), 56 << 20))

    flops = 2 * N * N * B * Fin + 2 * N * B * Fin * Fout
    bytes_accessed = (N * N * in_itemsize
                      + N * B * Fin * in_itemsize
                      + Fin * Fout * in_itemsize
                      + (Fout * 4 if has_bias else 0)
                      + N * Lpad * out_itemsize)
    cost = pl.CostEstimate(flops=flops, transcendentals=0,
                           bytes_accessed=bytes_accessed)

    kernel = _make_gcn_kernel(B, Fin, Fout, pad, has_bias)

    out_slab = pl.pallas_call(
        kernel,
        out_shape=jax.ShapeDtypeStruct((N, Lpad), out_dtype),
        grid=grid,
        in_specs=in_specs,
        out_specs=out_specs,
        compiler_params=pltpu.CompilerParams(
            dimension_semantics=("parallel",),
            vmem_limit_bytes=vmem_limit,
        ),
        cost_estimate=cost,
    )(*args)

    # (N, Lpad) -> drop pad lanes -> (N, B, Fout) -> (B, N, Fout)
    return out_slab[:, :lanes].reshape(N, B, Fout).transpose(1, 0, 2)


if __name__ == "__main__":
    # Module hyperparameters (matching the PyTorch defaults at small scale)
    in_features = 16
    out_features = 32
    node_n = 48
    batch = 2

    key = jax.random.PRNGKey(0)
    k_w, k_att, k_b, k_x, k_att2, k_x2 = jax.random.split(key, 6)

    # reset_parameters(): uniform(-stdv, stdv) with stdv = 1/sqrt(out_features)
    stdv = 1.0 / math.sqrt(out_features)
    weight = jax.random.uniform(k_w, (in_features, out_features),
                                minval=-stdv, maxval=stdv, dtype=jnp.float32)
    att = jax.random.uniform(k_att, (node_n, node_n),
                             minval=-stdv, maxval=stdv, dtype=jnp.float32)
    bias = jax.random.uniform(k_b, (out_features,),
                              minval=-stdv, maxval=stdv, dtype=jnp.float32)
    x = jax.random.normal(k_x, (batch, node_n, in_features), dtype=jnp.float32)

    gcn = jax.jit(graph_convolution_o, static_argnames=("compute_dtype",))

    # (1) small shape, single-tile path, bias=True
    out = jax.block_until_ready(gcn(x, weight, att, bias))
    ref = jnp.matmul(att, jnp.matmul(x, weight)) + bias
    assert out.shape == (batch, node_n, out_features)
    assert jnp.allclose(out, ref, atol=1e-4, rtol=1e-4), "mismatch vs reference (bias)"

    # (2) bias=False path (static branch, separate kernel body)
    out_nb = jax.block_until_ready(gcn(x, weight, att, None))
    ref_nb = jnp.matmul(att, jnp.matmul(x, weight))
    assert jnp.allclose(out_nb, ref_nb, atol=1e-4, rtol=1e-4), "mismatch (no bias)"

    # (3) bf16 DMA path (f32 accumulation) -- loose tolerance, catches gross errors
    out_bf = jax.block_until_ready(gcn(x, weight, att, bias,
                                       compute_dtype=jnp.bfloat16))
    assert jnp.allclose(out_bf, ref, atol=5e-2, rtol=5e-2), "mismatch (bf16 path)"

    # (4) larger N exercises the row-tiled, pipelined grid path (N > 512)
    node_big = 1024
    att_big = jax.random.uniform(k_att2, (node_big, node_big),
                                 minval=-stdv, maxval=stdv, dtype=jnp.float32)
    x_big = jax.random.normal(k_x2, (batch, node_big, in_features),
                              dtype=jnp.float32)
    out_big = jax.block_until_ready(gcn(x_big, weight, att_big, bias))
    ref_big = jnp.matmul(att_big, jnp.matmul(x_big, weight)) + bias
    assert out_big.shape == (batch, node_big, out_features)
    assert jnp.allclose(out_big, ref_big, atol=2e-3, rtol=2e-3), "mismatch (tiled path)"

    print("KERNEL_OK")
</pallas_src>

<mosaic_0001>
module attributes {stable_mosaic.version = 11 : i64} {
  func.func @kernel(%arg0: i32, %arg1: memref<48x48xf32, #tpu.memory_space<vmem>>, %arg2: memref<48x32xf32, #tpu.memory_space<vmem>>, %arg3: memref<16x32xf32, #tpu.memory_space<vmem>>, %arg4: memref<1x32xf32, #tpu.memory_space<vmem>>, %arg5: memref<48x128xf32, #tpu.memory_space<vmem>>) attributes {dimension_semantics = [#tpu.dimension_semantics<parallel>], iteration_bounds = array<i64: 1>, scalar_prefetch = 0 : i64, scratch_operands = 0 : i64, tpu.core_type = #tpu.core_type<tc>, window_params = [{transform_indices = @transform_0, window_bounds = array<i64: 48, 48>}, {pipeline_mode = #tpu.pipeline_mode<synchronous>, transform_indices = @transform_1, window_bounds = array<i64: 48, 32>}, {pipeline_mode = #tpu.pipeline_mode<synchronous>, transform_indices = @transform_2, window_bounds = array<i64: 16, 32>}, {pipeline_mode = #tpu.pipeline_mode<synchronous>, transform_indices = @transform_3, window_bounds = array<i64: 1, 32>}, {transform_indices = @transform_4, window_bounds = array<i64: 48, 128>}]} {
    %c0 = arith.constant 0 : index
    %c0_0 = arith.constant 0 : index
    %0 = vector.load %arg4[%c0, %c0_0] : memref<1x32xf32, #tpu.memory_space<vmem>>, vector<1x32xf32>
    %c0_1 = arith.constant 0 : index
    %c0_2 = arith.constant 0 : index
    %1 = vector.load %arg1[%c0_1, %c0_2] : memref<48x48xf32, #tpu.memory_space<vmem>>, vector<48x48xf32>
    %c0_3 = arith.constant 0 : index
    %c0_4 = arith.constant 0 : index
    %2 = vector.load %arg2[%c0_3, %c0_4] : memref<48x32xf32, #tpu.memory_space<vmem>>, vector<48x32xf32>
    %cst = arith.constant dense<0.000000e+00> : vector<48x32xf32>
    %3 = tpu.matmul %1, %2, %cst {dimension_numbers = #tpu.dot_dimension_numbers<[1], [0], [0], [1], [0, 0, 1, 1], [], []>} : vector<48x48xf32>, vector<48x32xf32>, vector<48x32xf32> -> vector<48x32xf32>
    %c0_5 = arith.constant 0 : index
    %c0_6 = arith.constant 0 : index
    %4 = vector.load %arg3[%c0_5, %c0_6] : memref<16x32xf32, #tpu.memory_space<vmem>>, vector<16x32xf32>
    %5 = vector.extract_strided_slice %3 {offsets = [0, 0], sizes = [48, 16], strides = [1, 1]} : vector<48x32xf32> to vector<48x16xf32>
    %cst_7 = arith.constant dense<0.000000e+00> : vector<48x32xf32>
    %6 = tpu.matmul %5, %4, %cst_7 {dimension_numbers = #tpu.dot_dimension_numbers<[1], [0], [0], [1], [0, 0, 1, 1], [], []>} : vector<48x16xf32>, vector<16x32xf32>, vector<48x32xf32> -> vector<48x32xf32>
    %7 = vector.broadcast %0 : vector<1x32xf32> to vector<48x32xf32>
    %8 = arith.addf %6, %7 : vector<48x32xf32>
    %9 = vector.extract_strided_slice %3 {offsets = [0, 16], sizes = [48, 16], strides = [1, 1]} : vector<48x32xf32> to vector<48x16xf32>
    %cst_8 = arith.constant dense<0.000000e+00> : vector<48x32xf32>
    %10 = tpu.matmul %9, %4, %cst_8 {dimension_numbers = #tpu.dot_dimension_numbers<[1], [0], [0], [1], [0, 0, 1, 1], [], []>} : vector<48x16xf32>, vector<16x32xf32>, vector<48x32xf32> -> vector<48x32xf32>
    %11 = vector.broadcast %0 : vector<1x32xf32> to vector<48x32xf32>
    %12 = arith.addf %10, %11 : vector<48x32xf32>
    %cst_9 = arith.constant 0.000000e+00 : f32
    %13 = vector.broadcast %cst_9 : f32 to vector<48x64xf32>
    %14 = tpu.concatenate %8, %12, %13 in 1 : vector<48x32xf32>, vector<48x32xf32>, vector<48x64xf32> -> vector<48x128xf32>
    %c0_10 = arith.constant 0 : index
    %c0_11 = arith.constant 0 : index
    %15 = vector.load %arg5[%c0_10, %c0_11] : memref<48x128xf32, #tpu.memory_space<vmem>>, vector<48x128xf32>
    tpu.vector_store %arg5[%c0_10, %c0_11], %14 {strides = array<i32>} : memref<48x128xf32, #tpu.memory_space<vmem>>, vector<48x128xf32>,
    return
  }
  func.func @transform_0(%arg0: i32) -> (i32, i32) {
    %c0_i32 = arith.constant 0 : i32
    %c0_i32_0 = arith.constant 0 : i32
    return %arg0, %c0_i32 : i32, i32
  }
  func.func @transform_1(%arg0: i32) -> (i32, i32) {
    %c0_i32 = arith.constant 0 : i32
    %c0_i32_0 = arith.constant 0 : i32
    %c0_i32_1 = arith.constant 0 : i32
    return %c0_i32, %c0_i32_0 : i32, i32
  }
  func.func @transform_2(%arg0: i32) -> (i32, i32) {
    %c0_i32 = arith.constant 0 : i32
    %c0_i32_0 = arith.constant 0 : i32
    %c0_i32_1 = arith.constant 0 : i32
    return %c0_i32, %c0_i32_0 : i32, i32
  }
  func.func @transform_3(%arg0: i32) -> (i32, i32) {
    %c0_i32 = arith.constant 0 : i32
    %c0_i32_0 = arith.constant 0 : i32
    %c0_i32_1 = arith.constant 0 : i32
    return %c0_i32, %c0_i32_0 : i32, i32
  }
  func.func @transform_4(%arg0: i32) -> (i32, i32) {
    %c0_i32 = arith.constant 0 : i32
    %c0_i32_0 = arith.constant 0 : i32
    return %arg0, %c0_i32 : i32, i32
  }
}

</mosaic_0001>

<bundles_post_ra>
// kernel: graph_convolution_o.1
= control target key start
LH: loop header
LB: loop body
LE: loop exit
PB: predicated region body
PF: predicated region fallthrough
CT: control target
= control target key end

     0   :  { %vm30_vm0 = vcmask 392192   ;;  %vm152_vm1 = vcmask 130048   ;;  %s549_s15 = smov 112   ;;  %s550_s17 = smov 32   ;;  %vm409_vm2 = vcmask 261120   ;;  %vm416_vm3 = vcmask 523264   ;;  %s669_s1 = inlined_call_operand.vmem [shape: f32[48,32], index: 1, kind: input, shape index: {}]   ;;  %s670_s0 = inlined_call_operand.vmem [shape: f32[48,48], index: 0, kind: input, shape index: {}]   ;;  %s671_s2 = inlined_call_operand.vmem [shape: f32[16,32], index: 2, kind: input, shape index: {}]   ;;  %s672_s3 = inlined_call_operand.vmem [shape: f32[1,32], index: 3, kind: input, shape index: {}]   ;;  %s673_s4 = inlined_call_operand.vmem [shape: f32[48,128], index: 4, kind: output, shape index: {}]  }
   0x1   :  { %v24_v0 = vld [vmem:[%s669_s1] sm:$0xff]  ;;  %v25_v1 = vld [vmem:[%s669_s1 + $0x8] sm:$0xff]  ;;  %v26_v2 = vld [vmem:[%s669_s1 + $0x10] sm:$0xff] }
   0x2   :  { %v527_v3 = vpack.c.bf16 %v25_v1, %v24_v0  ;;  %v27_v4 = vld [vmem:[%s669_s1 + $0x18] sm:$0xff]  ;;  %v28_v6 = vld [vmem:[%s669_s1 + $0x20] sm:$0xff]  ;;  %v29_v7 = vld [vmem:[%s669_s1 + $0x28] sm:$0xff] }
   0x3   :  { %v531_v5 = vpack.c.bf16 %v27_v4, %v26_v2  ;;  %v18_v8 = vld [vmem:[%s670_s0] sm:$0xff]  ;;  %v145_v10 = vld [vmem:[%s671_s2 + $0x8] sm:$0xff]  ;;  %v535_v11 = vpack.c.bf16 %v29_v7, %v28_v6  ;;  %v20_v14 = vld [vmem:[%s670_s0 + $0x10] sm:$0xff] }
   0x4   :  { %528 = vmatprep.subr.bf16.mxu0 %v527_v3  ;;  %492 = vmatprep.mubr.msk.f32.mxu0 %vm30_vm0, %v18_v8  ;;  %v144_v9 = vld [vmem:[%s671_s2] sm:$0xff]  ;;  %v19_v13 = vld [vmem:[%s670_s0 + $0x8] sm:$0xff]  ;;  %v21_v15 = vld [vmem:[%s670_s0 + $0x18] sm:$0xff] }
   0x5   :  { %530 = vmatpush3.bf16.msra.mxu0 %v527_v3  ;;  %v539_v12 = vpack.c.bf16 %v145_v10, %v144_v9  ;;  %v22_v16 = vld [vmem:[%s670_s0 + $0x20] sm:$0xff]  ;;  %v23_v17 = vld [vmem:[%s670_s0 + $0x28] sm:$0xff] }
   0x6   :  { %532 = vmatprep.subr.bf16.mxu0 %v531_v5  ;;  %v439_v36 = vld [vmem:[%s672_s3] ss:$0 sm:$0xff] }
   0x7   :  { %540 = vmatprep.subr.bf16.mxu1 %v539_v12 }
   0x8   :  { %542 = vmatpush3.bf16.msra.mxu1 %v539_v12 }
   0x9   :  { %534 = vmatpush3.bf16.msra.mxu0 %v531_v5  ;;  %544 = vmatprep.subr.bf16.mxu1 %v539_v12 }
   0xa   :  { %536 = vmatprep.subr.bf16.mxu0 %v535_v11 }
   0xd   :  { %538 = vmatpush3.bf16.msra.mxu0 %v535_v11 }
  0x10   :  { %493 = vmatmul.mubr.msk.f32.vlgmr.msra.gmra.mrb[0].mxu0 %vm30_vm0, %v19_v13 }
  0x11   :  { %495 = vmatprep.mubr.msk.f32.mxu0 %vm30_vm0, %v20_v14 }
  0x14   :  { %496 = vmatmul.mubr.msk.f32.gmra.mrb[2].mxu0 %vm30_vm0, %v21_v15 }
  0x15   :  { %498 = vmatprep.mubr.msk.f32.mxu0 %vm30_vm0, %v22_v16 }
  0x18   :  { %499 = vmatmul.mubr.msk.f32.gmra.mrb[4].mxu0 %vm30_vm0, %v23_v17 }
  0xe3   :  { %v494_v18 = vpop.f32.mrb[0].mxu0 }
  0xe4   :  { %v115_v19 = vpop.f32.mrb[1].mxu0 }
  0xe5   :  { %266 = vrot.lane.b32.xlu0 %v115_v19, %s549_s15  ;;  %505 = vmatprep.mubr.msk.f32.mxu1 %vm152_vm1, %v115_v19 }
  0xe6   :  { %506 = vmatmul.mubr.msk.f32.vlgmr.msra.gmra.mrb[0].mxu1 %vm152_vm1, %v494_v18 }
  0xe7   :  { %v497_v20 = vpop.f32.mrb[2].mxu0  ;;  %546 = vmatpush3.bf16.msra.mxu1 %v539_v12 }
  0xe8   :  { %v125_v21 = vpop.f32.mrb[3].mxu0 }
  0xe9   :  { %268 = vrot.lane.b32.xlu0 %v494_v18, %s549_s15  ;;  %270 = vrot.lane.b32.xlu1 %v125_v21, %s549_s15 }
  0xea   :  { %508 = vmatprep.mubr.msk.f32.mxu1 %vm152_vm1, %v125_v21 }
  0xeb   :  { %509 = vmatmul.mubr.msk.f32.gmra.mrb[2].mxu1 %vm152_vm1, %v497_v20  ;;  %v500_v22 = vpop.f32.mrb[4].mxu0 }
  0xec   :  { %v135_v23 = vpop.f32.mrb[5].mxu0 }
  0xed   :  { %272 = vrot.lane.b32.xlu1 %v497_v20, %s549_s15  ;;  %511 = vmatprep.mubr.msk.f32.mxu1 %vm152_vm1, %v135_v23 }
  0xee   :  { %274 = vrot.lane.b32.xlu0 %v135_v23, %s549_s15 }
  0xef   :  { %512 = vmatmul.mubr.msk.f32.gmra.mrb[4].mxu1 %vm152_vm1, %v500_v22 }
  0xf1   :  { %276 = vrot.lane.b32.xlu1 %v500_v22, %s549_s15 }
 0x157   :  { %v267_v24 = vpop.permute.xlu0 %266 }
 0x158   :  { %518 = vmatprep.mubr.msk.f32.mxu1 %vm152_vm1, %v267_v24 }
 0x15b   :  { %v269_v25 = vpop.permute.xlu0 %268  ;;  %v271_v26 = vpop.permute.xlu1 %270 }
 0x15c   :  { %519 = vmatmul.mubr.msk.f32.vlgmr.msra.gmra.mrb[6].mxu1 %vm152_vm1, %v269_v25 }
 0x15d   :  { %521 = vmatprep.mubr.msk.f32.mxu1 %vm152_vm1, %v271_v26 }
 0x15f   :  { %v273_v27 = vpop.permute.xlu1 %272 }
 0x160   :  { %522 = vmatmul.mubr.msk.f32.gmra.mrb[8].mxu1 %vm152_vm1, %v273_v27  ;;  %v275_v28 = vpop.permute.xlu0 %274 }
 0x161   :  { %524 = vmatprep.mubr.msk.f32.mxu1 %vm152_vm1, %v275_v28 }
 0x163   :  { %v277_v29 = vpop.permute.xlu1 %276 }
 0x164   :  { %525 = vmatmul.mubr.msk.f32.gmra.mrb[10].mxu1 %vm152_vm1, %v277_v29 }
 0x1b9   :  { %v507_v30 = vpop.f32.mrb[0].mxu1 }
 0x1ba   :  { %v237_v31 = vpop.f32.mrb[1].mxu1  ;;  %v243_v49 = vadd.f32 %v507_v30, %v439_v36 }
 0x1bb   :  { %v238_v50 = vadd.f32 %v439_v36, %v237_v31 }
 0x1be   :  { %v510_v32 = vpop.f32.mrb[2].mxu1 }
 0x1bf   :  { %v247_v33 = vpop.f32.mrb[3].mxu1  ;;  %v253_v56 = vadd.f32 %v510_v32, %v439_v36 }
 0x1c0   :  { %v248_v58 = vadd.f32 %v439_v36, %v247_v33 }
 0x1c2   :  { %v513_v34 = vpop.f32.mrb[4].mxu1 }
 0x1c3   :  { %v257_v35 = vpop.f32.mrb[5].mxu1  ;;  %v263_v0 = vadd.f32 %v513_v34, %v439_v36 }
 0x1c4   :  { %v258_v2 = vadd.f32 %v439_v36, %v257_v35 }
 0x22f   :  { %v520_v37 = vpop.f32.mrb[6].mxu1 }
 0x230   :  { %v362_v38 = vadd.f32 %v520_v37, %v439_v36  ;;  %v356_v39 = vpop.f32.mrb[7].mxu1 }
 0x231   :  { %v357_v40 = vadd.f32 %v439_v36, %v356_v39 }
 0x232   :  { %393 = vrot.lane.b32.xlu1 %v362_v38, %s550_s17 }
 0x233   :  { %v523_v41 = vpop.f32.mrb[8].mxu1  ;;  %391 = vrot.lane.b32.xlu0 %v357_v40, %s550_s17 }
 0x234   :  { %v372_v42 = vadd.f32 %v523_v41, %v439_v36  ;;  %v366_v43 = vpop.f32.mrb[9].mxu1 }
 0x235   :  { %v367_v44 = vadd.f32 %v439_v36, %v366_v43 }
 0x236   :  { %397 = vrot.lane.b32.xlu1 %v372_v42, %s550_s17 }
 0x237   :  { %v526_v45 = vpop.f32.mrb[10].mxu1  ;;  %395 = vrot.lane.b32.xlu0 %v367_v44, %s550_s17 }
 0x238   :  { %v382_v46 = vadd.f32 %v526_v45, %v439_v36  ;;  %v376_v47 = vpop.f32.mrb[11].mxu1 }
 0x239   :  { %v377_v48 = vadd.f32 %v439_v36, %v376_v47 }
 0x23a   :  { %401 = vrot.lane.b32.xlu1 %v382_v46, %s550_s17 }
 0x23b   :  { %399 = vrot.lane.b32.xlu0 %v377_v48, %s550_s17 }
 0x2a4   :  { %v394_v51 = vpop.permute.xlu1 %393 }
 0x2a5   :  { %v411_v52 = vsel %vm409_vm2, %v243_v49, %v394_v51  ;;  %v392_v53 = vpop.permute.xlu0 %391 }
 0x2a6   :  { %v418_v54 = vsel %vm416_vm3, %v411_v52, 0.0  ;;  %v410_v55 = vsel %vm409_vm2, %v238_v50, %v392_v53 }
 0x2a7   :  { %424 = vst [vmem:[%s673_s4 + $0x8] sm:$0xff] %v418_v54  ;;  %v417_v57 = vsel %vm416_vm3, %v410_v55, 0.0 }
 0x2a8   :  { %423 = vst [vmem:[%s673_s4] sm:$0xff] %v417_v57  ;;  %v398_v59 = vpop.permute.xlu1 %397 }
 0x2a9   :  { %v413_v60 = vsel %vm409_vm2, %v253_v56, %v398_v59  ;;  %v396_v61 = vpop.permute.xlu0 %395 }
 0x2aa   :  { %v420_v62 = vsel %vm416_vm3, %v413_v60, 0.0  ;;  %v412_v63 = vsel %vm409_vm2, %v248_v58, %v396_v61 }
 0x2ab   :  { %426 = vst [vmem:[%s673_s4 + $0x18] sm:$0xff] %v420_v62  ;;  %v419_v1 = vsel %vm416_vm3, %v412_v63, 0.0 }
 0x2ac   :  { %425 = vst [vmem:[%s673_s4 + $0x10] sm:$0xff] %v419_v1  ;;  %v402_v3 = vpop.permute.xlu1 %401 }
 0x2ad   :  { %v415_v4 = vsel %vm409_vm2, %v263_v0, %v402_v3  ;;  %v400_v5 = vpop.permute.xlu0 %399 }
 0x2ae   :  { %v422_v6 = vsel %vm416_vm3, %v415_v4, 0.0  ;;  %v414_v7 = vsel %vm409_vm2, %v258_v2, %v400_v5 }
 0x2af   :  { %428 = vst [vmem:[%s673_s4 + $0x28] sm:$0xff] %v422_v6  ;;  %v421_v8 = vsel %vm416_vm3, %v414_v7, 0.0 }
 0x2b0   :  { %427 = vst [vmem:[%s673_s4 + $0x20] sm:$0xff] %v421_v8 }

</bundles_post_ra>
